<compile_context>
chip_gen: v6e
topology: v6e:2x2x1
jax: 0.10.0
libtpu: 0.0.40
codegen_flags: <defaults>
</compile_context>

<pallas_src>
import functools
import math

import jax
import jax.numpy as jnp
import numpy as np
from jax.experimental import pallas as pl
from jax.experimental.pallas import tpu as pltpu


def _gconv_kernel(x_ref, apow_ref, wblk_ref, score_ref, base_ref, o_ref, *,
                  k_hops, hidden, tb):
    """One block of TB batch elements per grid step (batch folded into lanes).

    x_ref     : (N, TB*H)        input slab, compute dtype
    apow_ref  : (K, N, N)        adjacency powers adj_s^k (grid-invariant)
    wblk_ref  : (K, TB*H, TB*H)  block-diagonal hop weights I_TB ⊗ W_k^T (grid-invariant)
    score_ref : (TB, N, N)       pattern-wise attention scores for this block
    base_ref  : (N, TB*H)        hoisted x0 @ W0 + bias for this block (f32)
    o_ref     : (N, TB*H)        output slab
    """
    H = hidden
    cdt = x_ref.dtype
    x = x_ref[...]                                    # (N, TB*H)
    n, tbh = x.shape

    # ---- hop + projection: fully lane-dense, K independent MXU issues ------
    y = jnp.zeros((n, tbh), dtype=jnp.float32)
    for k in range(k_hops):                           # static, small
        hk = jnp.dot(apow_ref[k], x,
                     preferred_element_type=jnp.float32).astype(cdt)
        y = y + jnp.dot(hk, wblk_ref[k], preferred_element_type=jnp.float32)
    yc = y.astype(cdt)

    # ---- the only per-batch work left: score_b @ Y_b ------------------------
    outs = []
    for b in range(tb):                               # static, small
        lo = b * H
        outs.append(jnp.dot(score_ref[b], yc[:, lo:lo + H],
                            preferred_element_type=jnp.float32))
    acc = outs[0] if tb == 1 else jnp.concatenate(outs, axis=-1)

    # one lane-dense store of the whole (N, TB*H) block
    o_ref[...] = (base_ref[...] + acc).astype(o_ref.dtype)


def _vmem_capacity_bytes():
    """Physical VMEM per TensorCore (v5e/v6e: 128 MiB, v7x: 64 MiB)."""
    try:
        return int(pltpu.get_tpu_info().vmem_capacity_bytes)
    except Exception:
        return 64 * 1024 * 1024            # conservative (v7x) fallback


def _vmem_need(tb, n_nodes, hidden, k_hops, cdt_bytes):
    """Rough per-core VMEM footprint of one grid step (bytes)."""
    tbh = tb * hidden
    n = n_nodes
    per_step = (tb * n * n * cdt_bytes         # score block
                + n * tbh * cdt_bytes          # x slab
                + n * tbh * 4                  # base slab (f32)
                + n * tbh * 4)                 # output slab
    invariant = (k_hops * n * n * cdt_bytes          # adjacency powers
                 + k_hops * tbh * tbh * cdt_bytes)   # block-diagonal hop weights
    temps = 4 * n * tbh * 4                    # y / yc / hop product / concat
    # per-step streams are double-buffered; count invariants double-buffered
    # too (Pallas still allocates both pipeline buffers for them).
    return 2 * (per_step + invariant) + temps


def _pick_tb(batch, hidden, n_nodes, k_hops, cdt_bytes, vmem_budget,
             block_batch=None):
    """Pick the batch-block size TB and the (possibly padded) batch size."""
    if block_batch is not None:
        tb = int(block_batch)
        b_pad = -(-batch // tb) * tb
        if b_pad // tb > 1 and (tb * hidden) % 128 != 0:
            raise ValueError(
                "block_batch * hidden must be a multiple of 128 when the "
                "batch is split into more than one block")
        return tb, b_pad

    def fits(tb):
        return _vmem_need(tb, n_nodes, hidden, k_hops, cdt_bytes) <= vmem_budget

    # Preferred: TB divides B (no padding -> no wasted score HBM traffic),
    # TB*H lane-dense (multiple of 128), within the VMEM budget.
    lane_ok = [t for t in range(1, batch + 1)
               if batch % t == 0 and (t * hidden) % 128 == 0 and fits(t)]
    if lane_ok:
        def rank(t):
            return (batch // t >= 2,           # >=2 grid steps (v7x dual TC, overlap)
                    (t * hidden) % 256 == 0,   # 256-wide MXU output (v6e/v7x)
                    min(t, 16), -t)            # big blocks, bounded per-batch unroll
        return max(lane_ok, key=rank), batch

    # Small / awkward batches: a single block covering the whole batch needs
    # neither lane alignment nor padding.
    if fits(batch):
        return batch, batch

    # Last resort: padded, lane-aligned blocks (tail waste, but lane-dense
    # and inside the VMEM budget).
    lane_mult = 128 // math.gcd(hidden, 128)
    tb = lane_mult
    while tb + lane_mult <= batch and fits(tb + lane_mult):
        tb += lane_mult
    # TODO(synk): if even the minimum lane-dense block does not fit (huge N),
    # an extra "arbitrary" grid axis tiling N is required.
    return tb, -(-batch // tb) * tb


def gconv_pallas(x, supports, score, weight, bias, *, order, support_len,
                 compute_dtype=jnp.bfloat16, block_batch=None,
                 score_buffers=None):
    """x: (B,N,H); supports: (S,N,N); score: (B,N,N);
    weight: (H, C) with C = H*(order*support_len+1) (nn.Linear layout);
    bias: (H,). Returns (B,N,H) in x.dtype.

    compute_dtype: MXU operand dtype (default bf16; accumulation stays f32).
    score_buffers: optional pipeline depth (>2) for the score stream.
    """
    B, N, H = x.shape
    S = supports.shape[0]
    assert S == support_len
    K = order * support_len
    C = H * (K + 1)
    assert weight.shape == (H, C)
    assert score.shape == (B, N, N)
    assert bias.shape == (H,)

    out_dtype = x.dtype
    cdt = jnp.dtype(compute_dtype) if compute_dtype is not None else jnp.dtype(x.dtype)
    cdt_bytes = cdt.itemsize

    vmem_cap = _vmem_capacity_bytes()
    TB, B_pad = _pick_tb(B, H, N, K, cdt_bytes, int(0.7 * vmem_cap),
                         block_batch=block_batch)

    xf = x.astype(jnp.float32)
    wf = weight.astype(jnp.float32)

    # ---- wrapper-side precompute (plain XLA, layout plumbing, not kernel) --
    # adjacency powers adj_s^k, stacked in the concat / weight order
    sup_f = supports.astype(jnp.float32)
    pows = []
    for s in range(support_len):
        p = sup_f[s]
        pows.append(p)
        for _ in range(1, order):
            p = jnp.dot(sup_f[s], p)
            pows.append(p)
    apow = jnp.stack(pows, axis=0).astype(cdt)                      # (K, N, N)

    # per-hop weights W_k^T (h_in -> h_out), block-diagonalized over the batch
    w_hops = wf.T[H:, :].reshape(K, H, H)                           # (K, H, H)
    eye_tb = jnp.eye(TB, dtype=jnp.float32)
    wblk = jnp.einsum("ab,kpq->kapbq", eye_tb, w_hops)
    wblk = wblk.reshape(K, TB * H, TB * H).astype(cdt)              # (K, TB*H, TB*H)

    # hoisted x0 @ W0 + bias (exact, f32)
    base = jnp.einsum("bnh,he->bne", xf, wf.T[:H, :]) + bias.astype(jnp.float32)

    # batch padding only when _pick_tb had to pad
    if B_pad != B:
        pad = ((0, B_pad - B), (0, 0), (0, 0))
        x_p, score_p, base_p = jnp.pad(xf, pad), jnp.pad(score, pad), jnp.pad(base, pad)
    else:
        x_p, score_p, base_p = xf, score, base

    # fold batch into lanes: (B, N, H) -> (N, B*H) lane-dense slabs
    x_slab = x_p.transpose(1, 0, 2).reshape(N, B_pad * H).astype(cdt)
    base_slab = base_p.transpose(1, 0, 2).reshape(N, B_pad * H)      # f32
    score_c = score_p.astype(cdt)

    kernel = functools.partial(_gconv_kernel, k_hops=K, hidden=H, tb=TB)

    score_spec = pl.BlockSpec((TB, N, N), lambda i: (i, 0, 0))
    if score_buffers is not None and score_buffers != 2:
        # deepen pipelining on the only per-step HBM stream that dominates
        score_spec = pl.BlockSpec((TB, N, N), lambda i: (i, 0, 0),
                                  pipeline_mode=pl.Buffered(score_buffers))

    need = _vmem_need(TB, N, H, K, cdt_bytes)
    vmem_limit = int(min(0.9 * vmem_cap, max(32 * 1024 * 1024, 1.5 * need)))

    ow = pl.pallas_call(
        kernel,
        out_shape=jax.ShapeDtypeStruct((N, B_pad * H), out_dtype),
        grid=(B_pad // TB,),
        in_specs=[
            pl.BlockSpec((N, TB * H), lambda i: (0, i)),             # x slab
            pl.BlockSpec((K, N, N), lambda i: (0, 0, 0)),            # adjacency powers
            pl.BlockSpec((K, TB * H, TB * H), lambda i: (0, 0, 0)),  # block-diag weights
            score_spec,                                              # score block
            pl.BlockSpec((N, TB * H), lambda i: (0, i)),             # base slab (f32)
        ],
        out_specs=pl.BlockSpec((N, TB * H), lambda i: (0, i)),
        compiler_params=pltpu.CompilerParams(
            dimension_semantics=("parallel",),
            vmem_limit_bytes=vmem_limit,
        ),
    )(x_slab, apow, wblk, score_c, base_slab)

    # unfold lanes back to (B, N, H) and drop any batch padding
    out = ow.reshape(N, B_pad, H).transpose(1, 0, 2)
    return out[:B]


def gconv_reference(x, supports, score, weight, bias, *, order, support_len):
    """Pure-JAX reference mirroring the PyTorch forward."""
    out = [x]
    for s in range(support_len):
        adj = supports[s]
        x1 = jnp.einsum("nm,bmh->bnh", adj, x)
        out.append(jnp.einsum("bnm,bmh->bnh", score, x1))
        for _ in range(1, order):
            x1 = jnp.einsum("nm,bmh->bnh", adj, x1)
            out.append(jnp.einsum("bnm,bmh->bnh", score, x1))
    cat = jnp.concatenate(out, axis=-1)
    return cat @ weight.T + bias


if __name__ == "__main__":
    def make_inputs(key, B, N, H, order, support_len):
        C = H * (order * support_len + 1)
        kx, ks, ksc, kw, kb = jax.random.split(key, 5)
        x = jax.random.normal(kx, (B, N, H), dtype=jnp.float32)
        supports = jax.random.uniform(ks, (support_len, N, N), dtype=jnp.float32)
        supports = supports / jnp.sum(supports, axis=-1, keepdims=True)
        score = jax.nn.softmax(
            jax.random.normal(ksc, (B, N, N), dtype=jnp.float32), axis=-1)
        bound = 1.0 / np.sqrt(C)
        weight = jax.random.uniform(kw, (H, C), minval=-bound, maxval=bound,
                                    dtype=jnp.float32)
        bias = jax.random.uniform(kb, (H,), minval=-bound, maxval=bound,
                                  dtype=jnp.float32)
        return x, supports, score, weight, bias

    order, support_len = 2, 3
    key = jax.random.PRNGKey(0)
    k1, k2 = jax.random.split(key)

    # ---- small shape consistent with the module: B=2, N=16, H=32 ----------
    x, supports, score, weight, bias = make_inputs(k1, 2, 16, 32,
                                                   order, support_len)
    ref = gconv_reference(x, supports, score, weight, bias,
                          order=order, support_len=support_len)

    # exact f32 path (single block, no batch padding)
    out_f32 = gconv_pallas(x, supports, score, weight, bias,
                           order=order, support_len=support_len,
                           compute_dtype=jnp.float32)
    out_f32 = jax.block_until_ready(out_f32)
    np.testing.assert_allclose(np.asarray(out_f32), np.asarray(ref),
                               rtol=1e-4, atol=1e-4)

    # default bf16-operand path (f32 MXU accumulation)
    out_bf16 = gconv_pallas(x, supports, score, weight, bias,
                            order=order, support_len=support_len)
    out_bf16 = jax.block_until_ready(out_bf16)
    np.testing.assert_allclose(np.asarray(out_bf16), np.asarray(ref),
                               rtol=5e-2, atol=5e-2)

    # ---- multi-block grid path: B=8 -> TB=4, two lane-dense 128-wide blocks
    x8, sup8, sc8, w8, b8 = make_inputs(k2, 8, 16, 32, order, support_len)
    ref8 = gconv_reference(x8, sup8, sc8, w8, b8,
                           order=order, support_len=support_len)
    out8 = gconv_pallas(x8, sup8, sc8, w8, b8, order=order,
                        support_len=support_len, compute_dtype=jnp.float32)
    out8 = jax.block_until_ready(out8)
    np.testing.assert_allclose(np.asarray(out8), np.asarray(ref8),
                               rtol=1e-4, atol=1e-4)

    print("KERNEL_OK")
</pallas_src>

<mosaic_0001>
module attributes {stable_mosaic.version = 11 : i64} {
  func.func @_gconv_kernel(%arg0: i32, %arg1: memref<16x64xf32, #tpu.memory_space<vmem>>, %arg2: memref<6x16x16xf32, #tpu.memory_space<vmem>>, %arg3: memref<6x64x64xf32, #tpu.memory_space<vmem>>, %arg4: memref<2x16x16xf32, #tpu.memory_space<vmem>>, %arg5: memref<16x64xf32, #tpu.memory_space<vmem>>, %arg6: memref<16x64xf32, #tpu.memory_space<vmem>>) attributes {dimension_semantics = [#tpu.dimension_semantics<parallel>], iteration_bounds = array<i64: 1>, scalar_prefetch = 0 : i64, scratch_operands = 0 : i64, tpu.core_type = #tpu.core_type<tc>, window_params = [{transform_indices = @transform_0, window_bounds = array<i64: 16, 64>}, {pipeline_mode = #tpu.pipeline_mode<synchronous>, transform_indices = @transform_1, window_bounds = array<i64: 6, 16, 16>}, {pipeline_mode = #tpu.pipeline_mode<synchronous>, transform_indices = @transform_2, window_bounds = array<i64: 6, 64, 64>}, {transform_indices = @transform_3, window_bounds = array<i64: 2, 16, 16>}, {transform_indices = @transform_4, window_bounds = array<i64: 16, 64>}, {transform_indices = @transform_5, window_bounds = array<i64: 16, 64>}]} {
    %c0 = arith.constant 0 : index
    %c0_0 = arith.constant 0 : index
    %0 = vector.load %arg1[%c0, %c0_0] : memref<16x64xf32, #tpu.memory_space<vmem>>, vector<16x64xf32>
    %cst = arith.constant 0.000000e+00 : f32
    %1 = vector.broadcast %cst : f32 to vector<16x64xf32>
    %c0_1 = arith.constant 0 : index
    %c0_2 = arith.constant 0 : index
    %c0_3 = arith.constant 0 : index
    %2 = vector.load %arg2[%c0_1, %c0_2, %c0_3] : memref<6x16x16xf32, #tpu.memory_space<vmem>>, vector<1x16x16xf32>
    %3 = vector.shape_cast %2 : vector<1x16x16xf32> to vector<16x16xf32>
    %cst_4 = arith.constant dense<0.000000e+00> : vector<16x64xf32>
    %4 = tpu.matmul %3, %0, %cst_4 {dimension_numbers = #tpu.dot_dimension_numbers<[1], [0], [0], [1], [0, 0, 1, 1], [], []>} : vector<16x16xf32>, vector<16x64xf32>, vector<16x64xf32> -> vector<16x64xf32>
    %c0_5 = arith.constant 0 : index
    %c0_6 = arith.constant 0 : index
    %c0_7 = arith.constant 0 : index
    %5 = vector.load %arg3[%c0_5, %c0_6, %c0_7] : memref<6x64x64xf32, #tpu.memory_space<vmem>>, vector<1x64x64xf32>
    %6 = vector.shape_cast %5 : vector<1x64x64xf32> to vector<64x64xf32>
    %cst_8 = arith.constant dense<0.000000e+00> : vector<16x64xf32>
    %7 = tpu.matmul %4, %6, %cst_8 {dimension_numbers = #tpu.dot_dimension_numbers<[1], [0], [0], [1], [0, 0, 1, 1], [], []>} : vector<16x64xf32>, vector<64x64xf32>, vector<16x64xf32> -> vector<16x64xf32>
    %8 = arith.addf %1, %7 : vector<16x64xf32>
    %c1 = arith.constant 1 : index
    %c0_9 = arith.constant 0 : index
    %c0_10 = arith.constant 0 : index
    %9 = vector.load %arg2[%c1, %c0_9, %c0_10] : memref<6x16x16xf32, #tpu.memory_space<vmem>>, vector<1x16x16xf32>
    %10 = vector.shape_cast %9 : vector<1x16x16xf32> to vector<16x16xf32>
    %cst_11 = arith.constant dense<0.000000e+00> : vector<16x64xf32>
    %11 = tpu.matmul %10, %0, %cst_11 {dimension_numbers = #tpu.dot_dimension_numbers<[1], [0], [0], [1], [0, 0, 1, 1], [], []>} : vector<16x16xf32>, vector<16x64xf32>, vector<16x64xf32> -> vector<16x64xf32>
    %c1_12 = arith.constant 1 : index
    %c0_13 = arith.constant 0 : index
    %c0_14 = arith.constant 0 : index
    %12 = vector.load %arg3[%c1_12, %c0_13, %c0_14] : memref<6x64x64xf32, #tpu.memory_space<vmem>>, vector<1x64x64xf32>
    %13 = vector.shape_cast %12 : vector<1x64x64xf32> to vector<64x64xf32>
    %cst_15 = arith.constant dense<0.000000e+00> : vector<16x64xf32>
    %14 = tpu.matmul %11, %13, %cst_15 {dimension_numbers = #tpu.dot_dimension_numbers<[1], [0], [0], [1], [0, 0, 1, 1], [], []>} : vector<16x64xf32>, vector<64x64xf32>, vector<16x64xf32> -> vector<16x64xf32>
    %15 = arith.addf %8, %14 : vector<16x64xf32>
    %c2 = arith.constant 2 : index
    %c0_16 = arith.constant 0 : index
    %c0_17 = arith.constant 0 : index
    %16 = vector.load %arg2[%c2, %c0_16, %c0_17] : memref<6x16x16xf32, #tpu.memory_space<vmem>>, vector<1x16x16xf32>
    %17 = vector.shape_cast %16 : vector<1x16x16xf32> to vector<16x16xf32>
    %cst_18 = arith.constant dense<0.000000e+00> : vector<16x64xf32>
    %18 = tpu.matmul %17, %0, %cst_18 {dimension_numbers = #tpu.dot_dimension_numbers<[1], [0], [0], [1], [0, 0, 1, 1], [], []>} : vector<16x16xf32>, vector<16x64xf32>, vector<16x64xf32> -> vector<16x64xf32>
    %c2_19 = arith.constant 2 : index
    %c0_20 = arith.constant 0 : index
    %c0_21 = arith.constant 0 : index
    %19 = vector.load %arg3[%c2_19, %c0_20, %c0_21] : memref<6x64x64xf32, #tpu.memory_space<vmem>>, vector<1x64x64xf32>
    %20 = vector.shape_cast %19 : vector<1x64x64xf32> to vector<64x64xf32>
    %cst_22 = arith.constant dense<0.000000e+00> : vector<16x64xf32>
    %21 = tpu.matmul %18, %20, %cst_22 {dimension_numbers = #tpu.dot_dimension_numbers<[1], [0], [0], [1], [0, 0, 1, 1], [], []>} : vector<16x64xf32>, vector<64x64xf32>, vector<16x64xf32> -> vector<16x64xf32>
    %22 = arith.addf %15, %21 : vector<16x64xf32>
    %c3 = arith.constant 3 : index
    %c0_23 = arith.constant 0 : index
    %c0_24 = arith.constant 0 : index
    %23 = vector.load %arg2[%c3, %c0_23, %c0_24] : memref<6x16x16xf32, #tpu.memory_space<vmem>>, vector<1x16x16xf32>
    %24 = vector.shape_cast %23 : vector<1x16x16xf32> to vector<16x16xf32>
    %cst_25 = arith.constant dense<0.000000e+00> : vector<16x64xf32>
    %25 = tpu.matmul %24, %0, %cst_25 {dimension_numbers = #tpu.dot_dimension_numbers<[1], [0], [0], [1], [0, 0, 1, 1], [], []>} : vector<16x16xf32>, vector<16x64xf32>, vector<16x64xf32> -> vector<16x64xf32>
    %c3_26 = arith.constant 3 : index
    %c0_27 = arith.constant 0 : index
    %c0_28 = arith.constant 0 : index
    %26 = vector.load %arg3[%c3_26, %c0_27, %c0_28] : memref<6x64x64xf32, #tpu.memory_space<vmem>>, vector<1x64x64xf32>
    %27 = vector.shape_cast %26 : vector<1x64x64xf32> to vector<64x64xf32>
    %cst_29 = arith.constant dense<0.000000e+00> : vector<16x64xf32>
    %28 = tpu.matmul %25, %27, %cst_29 {dimension_numbers = #tpu.dot_dimension_numbers<[1], [0], [0], [1], [0, 0, 1, 1], [], []>} : vector<16x64xf32>, vector<64x64xf32>, vector<16x64xf32> -> vector<16x64xf32>
    %29 = arith.addf %22, %28 : vector<16x64xf32>
    %c4 = arith.constant 4 : index
    %c0_30 = arith.constant 0 : index
    %c0_31 = arith.constant 0 : index
    %30 = vector.load %arg2[%c4, %c0_30, %c0_31] : memref<6x16x16xf32, #tpu.memory_space<vmem>>, vector<1x16x16xf32>
    %31 = vector.shape_cast %30 : vector<1x16x16xf32> to vector<16x16xf32>
    %cst_32 = arith.constant dense<0.000000e+00> : vector<16x64xf32>
    %32 = tpu.matmul %31, %0, %cst_32 {dimension_numbers = #tpu.dot_dimension_numbers<[1], [0], [0], [1], [0, 0, 1, 1], [], []>} : vector<16x16xf32>, vector<16x64xf32>, vector<16x64xf32> -> vector<16x64xf32>
    %c4_33 = arith.constant 4 : index
    %c0_34 = arith.constant 0 : index
    %c0_35 = arith.constant 0 : index
    %33 = vector.load %arg3[%c4_33, %c0_34, %c0_35] : memref<6x64x64xf32, #tpu.memory_space<vmem>>, vector<1x64x64xf32>
    %34 = vector.shape_cast %33 : vector<1x64x64xf32> to vector<64x64xf32>
    %cst_36 = arith.constant dense<0.000000e+00> : vector<16x64xf32>
    %35 = tpu.matmul %32, %34, %cst_36 {dimension_numbers = #tpu.dot_dimension_numbers<[1], [0], [0], [1], [0, 0, 1, 1], [], []>} : vector<16x64xf32>, vector<64x64xf32>, vector<16x64xf32> -> vector<16x64xf32>
    %36 = arith.addf %29, %35 : vector<16x64xf32>
    %c5 = arith.constant 5 : index
    %c0_37 = arith.constant 0 : index
    %c0_38 = arith.constant 0 : index
    %37 = vector.load %arg2[%c5, %c0_37, %c0_38] : memref<6x16x16xf32, #tpu.memory_space<vmem>>, vector<1x16x16xf32>
    %38 = vector.shape_cast %37 : vector<1x16x16xf32> to vector<16x16xf32>
    %cst_39 = arith.constant dense<0.000000e+00> : vector<16x64xf32>
    %39 = tpu.matmul %38, %0, %cst_39 {dimension_numbers = #tpu.dot_dimension_numbers<[1], [0], [0], [1], [0, 0, 1, 1], [], []>} : vector<16x16xf32>, vector<16x64xf32>, vector<16x64xf32> -> vector<16x64xf32>
    %c5_40 = arith.constant 5 : index
    %c0_41 = arith.constant 0 : index
    %c0_42 = arith.constant 0 : index
    %40 = vector.load %arg3[%c5_40, %c0_41, %c0_42] : memref<6x64x64xf32, #tpu.memory_space<vmem>>, vector<1x64x64xf32>
    %41 = vector.shape_cast %40 : vector<1x64x64xf32> to vector<64x64xf32>
    %cst_43 = arith.constant dense<0.000000e+00> : vector<16x64xf32>
    %42 = tpu.matmul %39, %41, %cst_43 {dimension_numbers = #tpu.dot_dimension_numbers<[1], [0], [0], [1], [0, 0, 1, 1], [], []>} : vector<16x64xf32>, vector<64x64xf32>, vector<16x64xf32> -> vector<16x64xf32>
    %43 = arith.addf %36, %42 : vector<16x64xf32>
    %c0_44 = arith.constant 0 : index
    %c0_45 = arith.constant 0 : index
    %c0_46 = arith.constant 0 : index
    %44 = vector.load %arg4[%c0_44, %c0_45, %c0_46] : memref<2x16x16xf32, #tpu.memory_space<vmem>>, vector<1x16x16xf32>
    %45 = vector.shape_cast %44 : vector<1x16x16xf32> to vector<16x16xf32>
    %46 = vector.extract_strided_slice %43 {offsets = [0, 0], sizes = [16, 32], strides = [1, 1]} : vector<16x64xf32> to vector<16x32xf32>
    %cst_47 = arith.constant dense<0.000000e+00> : vector<16x32xf32>
    %47 = tpu.matmul %45, %46, %cst_47 {dimension_numbers = #tpu.dot_dimension_numbers<[1], [0], [0], [1], [0, 0, 1, 1], [], []>} : vector<16x16xf32>, vector<16x32xf32>, vector<16x32xf32> -> vector<16x32xf32>
    %c1_48 = arith.constant 1 : index
    %c0_49 = arith.constant 0 : index
    %c0_50 = arith.constant 0 : index
    %48 = vector.load %arg4[%c1_48, %c0_49, %c0_50] : memref<2x16x16xf32, #tpu.memory_space<vmem>>, vector<1x16x16xf32>
    %49 = vector.shape_cast %48 : vector<1x16x16xf32> to vector<16x16xf32>
    %50 = vector.extract_strided_slice %43 {offsets = [0, 32], sizes = [16, 32], strides = [1, 1]} : vector<16x64xf32> to vector<16x32xf32>
    %cst_51 = arith.constant dense<0.000000e+00> : vector<16x32xf32>
    %51 = tpu.matmul %49, %50, %cst_51 {dimension_numbers = #tpu.dot_dimension_numbers<[1], [0], [0], [1], [0, 0, 1, 1], [], []>} : vector<16x16xf32>, vector<16x32xf32>, vector<16x32xf32> -> vector<16x32xf32>
    %52 = tpu.concatenate %47, %51 in 1 : vector<16x32xf32>, vector<16x32xf32> -> vector<16x64xf32>
    %c0_52 = arith.constant 0 : index
    %c0_53 = arith.constant 0 : index
    %53 = vector.load %arg5[%c0_52, %c0_53] : memref<16x64xf32, #tpu.memory_space<vmem>>, vector<16x64xf32>
    %54 = arith.addf %53, %52 : vector<16x64xf32>
    %c0_54 = arith.constant 0 : index
    %c0_55 = arith.constant 0 : index
    %55 = vector.load %arg6[%c0_54, %c0_55] : memref<16x64xf32, #tpu.memory_space<vmem>>, vector<16x64xf32>
    tpu.vector_store %arg6[%c0_54, %c0_55], %54 {strides = array<i32>} : memref<16x64xf32, #tpu.memory_space<vmem>>, vector<16x64xf32>,
    return
  }
  func.func @transform_0(%arg0: i32) -> (i32, i32) {
    %c0_i32 = arith.constant 0 : i32
    %c0_i32_0 = arith.constant 0 : i32
    return %c0_i32, %arg0 : i32, i32
  }
  func.func @transform_1(%arg0: i32) -> (i32, i32, i32) {
    %c0_i32 = arith.constant 0 : i32
    %c0_i32_0 = arith.constant 0 : i32
    %c0_i32_1 = arith.constant 0 : i32
    %c0_i32_2 = arith.constant 0 : i32
    return %c0_i32, %c0_i32_0, %c0_i32_1 : i32, i32, i32
  }
  func.func @transform_2(%arg0: i32) -> (i32, i32, i32) {
    %c0_i32 = arith.constant 0 : i32
    %c0_i32_0 = arith.constant 0 : i32
    %c0_i32_1 = arith.constant 0 : i32
    %c0_i32_2 = arith.constant 0 : i32
    return %c0_i32, %c0_i32_0, %c0_i32_1 : i32, i32, i32
  }
  func.func @transform_3(%arg0: i32) -> (i32, i32, i32) {
    %c0_i32 = arith.constant 0 : i32
    %c0_i32_0 = arith.constant 0 : i32
    %c0_i32_1 = arith.constant 0 : i32
    return %arg0, %c0_i32, %c0_i32_0 : i32, i32, i32
  }
  func.func @transform_4(%arg0: i32) -> (i32, i32) {
    %c0_i32 = arith.constant 0 : i32
    %c0_i32_0 = arith.constant 0 : i32
    return %c0_i32, %arg0 : i32, i32
  }
  func.func @transform_5(%arg0: i32) -> (i32, i32) {
    %c0_i32 = arith.constant 0 : i32
    %c0_i32_0 = arith.constant 0 : i32
    return %c0_i32, %arg0 : i32, i32
  }
}

</mosaic_0001>

<bundles_post_ra>
// kernel: tpu_custom_call.1
= control target key start
LH: loop header
LB: loop body
LE: loop exit
PB: predicated region body
PF: predicated region fallthrough
CT: control target
= control target key end

     0   :  { %10 = vsyncpa [#allocation3], 0  ;;  %s1922_s0 = inlined_call_operand.hbm [shape: f32[16,64], index: 0, kind: input, shape index: {}]   ;;  %s1923_s1 = inlined_call_operand.hbm [shape: f32[6,16,16], index: 1, kind: input, shape index: {}]   ;;  %s1924_s2 = inlined_call_operand.hbm [shape: f32[6,64,64], index: 2, kind: input, shape index: {}]   ;;  %s1925_s3 = inlined_call_operand.hbm [shape: f32[2,16,16], index: 3, kind: input, shape index: {}]   ;;  %s1926_s4 = inlined_call_operand.hbm [shape: f32[16,64], index: 4, kind: input, shape index: {}]   ;;  %s1927_s5 = inlined_call_operand.hbm [shape: f32[16,64], index: 5, kind: output, shape index: {}]  }
   0x1   :  { %11 = vsyncpa [#allocation6], 0 }
   0x2   :  { %12 = vsyncpa [#allocation9], 0 }
   0x3   :  { %13 = vsyncpa [#allocation4], 0  ;;  %s1782_s18 = smov [#allocation5]   ;;  %s1783_s20 = smov [#allocation8]  }
   0x4   :  { %s31_s19 = sshll.u32 %s1782_s18, 4  ;;  %s55_s21 = sshll.u32 %s1783_s20, 4  ;;  %s32_s19 = int_to_ptr.vmem [resolvable:$true] %s31_s19  ;;  %s56_s21 = int_to_ptr.vmem [resolvable:$true] %s55_s21 }
   0x5   :  { %s1662_s22 = scalar_lea.vmem %s32_s19, 1536  ;;  %p1667_p1 = scmp.lt.s32.totalorder %s32_s19, %s32_s19 }
   0x6   :  { %p1663_p0 = scmp.ne.s32.totalorder %s32_s19, %s1662_s22  ;;  %p1668_p2 = scmp.lt.s32.totalorder %s1662_s22, %s1662_s22 }
   0x8   :  { %p1669_p3 = por %p1668_p2, %p1667_p1 }
   0xa   :  { %p1670_p4 = pnand %p1669_p3, %p1663_p0 }
   0xc   :  { %1673 = shalt.err (!%p1670_p4)
}
   0xd   :  { %s1784_s23 = smov 128   ;;  %s1785_s24 = smov 8  }
   0xe   :  { %37 = dma.hbm_to_vmem [thread:$0]  %s1923_s1, 1536, %s32_s19, [#allocation6], %s1784_s23, %s1784_s23, %s1785_s24  }
   0xf   :  { %s1682_s27 = scalar_lea.vmem %s56_s21, 512  ;;  %p1687_p6 = scmp.lt.s32.totalorder %s56_s21, %s56_s21 }
  0x10   :  { %p1683_p5 = scmp.ne.s32.totalorder %s56_s21, %s1682_s27  ;;  %p1688_p7 = scmp.lt.s32.totalorder %s1682_s27, %s1682_s27 }
  0x12   :  { %p1689_p8 = por %p1688_p7, %p1687_p6 }
  0x14   :  { %p1690_p9 = pnand %p1689_p8, %p1683_p5 }
  0x16   :  { %1693 = shalt.err (!%p1690_p9)
}
  0x17   :  { %61 = dma.hbm_to_vmem [thread:$0]  %s1925_s3, 512, %s56_s21, [#allocation9], %s1784_s23, %s1784_s23, %s1785_s24  }
  0x18   :  { %s1786_s30 = smov [#allocation2]   ;;  %s1787_s7 = smov [#allocation7]  }
  0x19   :  { %s19_s6 = sshll.u32 %s1786_s30, 4  ;;  %s43_s8 = sshll.u32 %s1787_s7, 4  ;;  %s20_s6 = int_to_ptr.vmem [resolvable:$true] %s19_s6  ;;  %s44_s8 = int_to_ptr.vmem [resolvable:$true] %s43_s8 }
  0x1a   :  { %s1702_s1 = scalar_lea.vmem %s20_s6, 256  ;;  %p1707_p11 = scmp.lt.s32.totalorder %s20_s6, %s20_s6 }
  0x1b   :  { %p1703_p10 = scmp.ne.s32.totalorder %s20_s6, %s1702_s1  ;;  %p1708_p12 = scmp.lt.s32.totalorder %s1702_s1, %s1702_s1 }
  0x1d   :  { %p1709_p13 = por %p1708_p12, %p1707_p11 }
  0x1f   :  { %p1710_p0 = pnand %p1709_p13, %p1703_p10 }
  0x21   :  { %1713 = shalt.err (!%p1710_p0)
}
  0x22   :  { %25 = dma.hbm_to_vmem [thread:$0]  %s1922_s0, 256, %s20_s6, [#allocation3], %s1784_s23, %s1784_s23, %s1785_s24  }
  0x23   :  { %s1722_s3 = scalar_lea.vmem %s44_s8, 6144  ;;  %p1727_p2 = scmp.lt.s32.totalorder %s44_s8, %s44_s8 }
  0x24   :  { %p1723_p1 = scmp.ne.s32.totalorder %s44_s8, %s1722_s3  ;;  %p1728_p3 = scmp.lt.s32.totalorder %s1722_s3, %s1722_s3 }
  0x26   :  { %p1729_p4 = por %p1728_p3, %p1727_p2 }
  0x28   :  { %p1730_p5 = pnand %p1729_p4, %p1723_p1 }
  0x2a   :  { %1733 = shalt.err (!%p1730_p5)
}
  0x2b   :  { %49 = dma.hbm_to_vmem [thread:$0]  %s1924_s2, 6144, %s44_s8, [#allocation6], %s1784_s23, %s1784_s23, %s1785_s24  }
  0x2c   :  { %s1788_s13 = smov [#allocation10]  }
  0x2d   :  { %s67_s14 = sshll.u32 %s1788_s13, 4  ;;  %s68_s14 = int_to_ptr.vmem [resolvable:$true] %s67_s14 }
  0x2e   :  { %s1742_s15 = scalar_lea.vmem %s68_s14, 256  ;;  %p1747_p7 = scmp.lt.s32.totalorder %s68_s14, %s68_s14 }
  0x2f   :  { %p1743_p6 = scmp.ne.s32.totalorder %s68_s14, %s1742_s15  ;;  %p1748_p8 = scmp.lt.s32.totalorder %s1742_s15, %s1742_s15 }
  0x31   :  { %p1749_p9 = por %p1748_p8, %p1747_p7 }
  0x33   :  { %p1750_p10 = pnand %p1749_p9, %p1743_p6 }
  0x35   :  { %1753 = shalt.err (!%p1750_p10)
}
  0x36   :  { %73 = dma.hbm_to_vmem [thread:$0]  %s1926_s4, 256, %s68_s14, [#allocation9], %s1784_s23, %s1784_s23, %s1785_s24  }
  0x37   :  { %1774 = dma.done.wait [#allocation3], 256  }
  0x38   :  { %1775 = vsyncadd [#allocation3], 4294967040 }
  0x39   :  { %1776 = dma.done.wait [#allocation6], 7680  }
  0x3a   :  { %1777 = vsyncadd [#allocation6], 4294959616 }
  0x3b   :  { %1778 = dma.done.wait [#allocation9], 768  }
  0x3c   :  { %1779 = vsyncadd [#allocation9], 4294966528  ;;  %v1852_v0 = vld [vmem:[#allocation2 + $0x8] sm:$0xff]  ;;  %v1854_v1 = vld [vmem:[#allocation2] sm:$0xff]  ;;  %vm93_vm0 = vcmask 130048   ;;  %vm276_vm1 = vcmask 523264  }
  0x3d   :  { %1474 = vmatprep.subr.mxu0 %v1852_v0  ;;  %1481 = vmatprep.subr.mxu1 %v1852_v0  ;;  %v91_v2 = vld [vmem:[#allocation5] sm:$0xff]  ;;  %v184_v3 = vld [vmem:[#allocation5 + $0x10] sm:$0xff]  ;;  %v92_v4 = vld [vmem:[#allocation5 + $0x8] sm:$0xff]  ;;  %s1789_s2 = smov 96   ;;  %s1790_s4 = smov 32   ;;  %vm1326_vm2 = vcmask 261120  }
  0x3e   :  { %1475 = vmatpush3.msra.mxu0 %v1852_v0  ;;  %1482 = vmatpush3.msra.mxu1 %v1852_v0  ;;  %v185_v5 = vld [vmem:[#allocation5 + $0x18] sm:$0xff]  ;;  %v274_v8 = vld [vmem:[#allocation7 + $0x70] sm:$0xff]  ;;  %v273_v10 = vld [vmem:[#allocation7 + $0x68] sm:$0xff]  ;;  %s1791_s17 = smov [#allocation11]  }
  0x3f   :  { %1476 = vmatprep.subr.mxu0 %v1854_v1  ;;  %1483 = vmatprep.subr.mxu1 %v1854_v1  ;;  %v275_v6 = vld [vmem:[#allocation7 + $0x78] sm:$0xff]  ;;  %v181_v9 = vld [vmem:[#allocation7 + $0x30] sm:$0xff]  ;;  %v180_v11 = vld [vmem:[#allocation7 + $0x28] sm:$0xff]  ;;  %s1340_s18 = sshll.u32 %s1791_s17, 4  ;;  %s1341_s18 = int_to_ptr.vmem [resolvable:$true] %s1340_s18 }
  0x40   :  { %1477 = vmatpush3.msra.mxu0 %v1854_v1  ;;  %1478 = vmatprep.mubr.msk.f32.mxu0 %vm93_vm0, %v91_v2  ;;  %v182_v7 = vld [vmem:[#allocation7 + $0x38] sm:$0xff]  ;;  %v272_v12 = vld [vmem:[#allocation7 + $0x60] sm:$0xff]  ;;  %v270_v16 = vld [vmem:[#allocation7 + $0x50] sm:$0xff]  ;;  %s1754_s19 = scalar_lea.vmem %s1341_s18, 256  ;;  %p1759_p12 = scmp.lt.s32.totalorder %s1341_s18, %s1341_s18 }
  0x41   :  { %1484 = vmatpush3.msra.mxu1 %v1854_v1  ;;  %1485 = vmatprep.mubr.msk.f32.mxu1 %vm93_vm0, %v184_v3  ;;  %v179_v13 = vld [vmem:[#allocation7 + $0x20] sm:$0xff]  ;;  %v271_v14 = vld [vmem:[#allocation7 + $0x58] sm:$0xff]  ;;  %v177_v17 = vld [vmem:[#allocation7 + $0x10] sm:$0xff]  ;;  %p1755_p11 = scmp.ne.s32.totalorder %s1341_s18, %s1754_s19  ;;  %p1760_p13 = scmp.lt.s32.totalorder %s1754_s19, %s1754_s19 }
  0x42   :  { %1479 = vmatmul.mubr.msk.f32.vlgmr.msra.gmra.mxu0 %vm93_vm0, %v92_v4  ;;  %1486 = vmatmul.mubr.msk.f32.vlgmr.msra.gmra.mxu1 %vm93_vm0, %v185_v5  ;;  %v178_v15 = vld [vmem:[#allocation7 + $0x18] sm:$0xff]  ;;  %v269_v18 = vld [vmem:[#allocation7 + $0x48] sm:$0xff]  ;;  %v268_v20 = vld [vmem:[#allocation7 + $0x40] sm:$0xff] }
  0x43   :  { %1488 = vmatprep.subr.mxu0 %v275_v6  ;;  %1507 = vmatprep.subr.mxu1 %v182_v7  ;;  %v176_v19 = vld [vmem:[#allocation7 + $0x8] sm:$0xff]  ;;  %v175_v21 = vld [vmem:[#allocation7] sm:$0xff]  ;;  %v531_v22 = vld [vmem:[#allocation7 + $0xb8] sm:$0xff]  ;;  %p1761_p0 = por %p1760_p13, %p1759_p12 }
  0x44   :  { %1489 = vmatpush3.msra.mxu0 %v275_v6  ;;  %1508 = vmatpush3.msra.mxu1 %v182_v7  ;;  %v440_v27 = vld [vmem:[#allocation5 + $0x20] sm:$0xff]  ;;  %v530_v28 = vld [vmem:[#allocation7 + $0xb0] sm:$0xff]  ;;  %v441_v29 = vld [vmem:[#allocation5 + $0x28] sm:$0xff] }
  0x45   :  { %1490 = vmatprep.subr.mxu0 %v274_v8  ;;  %1509 = vmatprep.subr.mxu1 %v181_v9  ;;  %v616_v30 = vld [vmem:[#allocation5 + $0x30] sm:$0xff]  ;;  %v529_v31 = vld [vmem:[#allocation7 + $0xa8] sm:$0xff]  ;;  %v617_v32 = vld [vmem:[#allocation5 + $0x38] sm:$0xff]  ;;  %p1762_p1 = pnand %p1761_p0, %p1755_p11 }
  0x46   :  { %1491 = vmatpush3.msra.mxu0 %v274_v8  ;;  %1510 = vmatpush3.msra.mxu1 %v181_v9  ;;  %v707_v33 = vld [vmem:[#allocation7 + $0xf8] sm:$0xff]  ;;  %v528_v34 = vld [vmem:[#allocation7 + $0xa0] sm:$0xff]  ;;  %v706_v35 = vld [vmem:[#allocation7 + $0xf0] sm:$0xff] }
  0x47   :  { %1492 = vmatprep.subr.mxu0 %v273_v10  ;;  %1511 = vmatprep.subr.mxu1 %v180_v11  ;;  %v527_v36 = vld [vmem:[#allocation7 + $0x98] sm:$0xff]  ;;  %v705_v37 = vld [vmem:[#allocation7 + $0xe8] sm:$0xff]  ;;  %v526_v38 = vld [vmem:[#allocation7 + $0x90] sm:$0xff] }
  0x48   :  { %1493 = vmatpush3.msra.mxu0 %v273_v10  ;;  %1512 = vmatpush3.msra.mxu1 %v180_v11  ;;  %v704_v39 = vld [vmem:[#allocation7 + $0xe0] sm:$0xff]  ;;  %v525_v40 = vld [vmem:[#allocation7 + $0x88] sm:$0xff]  ;;  %v703_v41 = vld [vmem:[#allocation7 + $0xd8] sm:$0xff] }
  0x49   :  { %1494 = vmatprep.subr.mxu0 %v272_v12  ;;  %1513 = vmatprep.subr.mxu1 %v179_v13  ;;  %v524_v42 = vld [vmem:[#allocation7 + $0x80] sm:$0xff]  ;;  %v702_v43 = vld [vmem:[#allocation7 + $0xd0] sm:$0xff]  ;;  %v701_v44 = vld [vmem:[#allocation7 + $0xc8] sm:$0xff] }
  0x4a   :  { %1495 = vmatpush3.msra.mxu0 %v272_v12  ;;  %1514 = vmatpush3.msra.mxu1 %v179_v13  ;;  %v700_v45 = vld [vmem:[#allocation7 + $0xc0] sm:$0xff]  ;;  %v793_v54 = vld [vmem:[#allocation5 + $0x48] sm:$0xff]  ;;  %v968_v56 = vld [vmem:[#allocation5 + $0x50] sm:$0xff] }
  0x4b   :  { %1496 = vmatprep.subr.mxu0 %v271_v14  ;;  %1515 = vmatprep.subr.mxu1 %v178_v15  ;;  %v792_v52 = vld [vmem:[#allocation5 + $0x40] sm:$0xff]  ;;  %v883_v57 = vld [vmem:[#allocation7 + $0x138] sm:$0xff]  ;;  %v882_v59 = vld [vmem:[#allocation7 + $0x130] sm:$0xff] }
  0x4c   :  { %1497 = vmatpush3.msra.mxu0 %v271_v14  ;;  %1516 = vmatpush3.msra.mxu1 %v178_v15  ;;  %v969_v58 = vld [vmem:[#allocation5 + $0x58] sm:$0xff]  ;;  %v881_v61 = vld [vmem:[#allocation7 + $0x128] sm:$0xff]  ;;  %v1058_v62 = vld [vmem:[#allocation7 + $0x170] sm:$0xff] }
  0x4d   :  { %1498 = vmatprep.subr.mxu0 %v270_v16  ;;  %1517 = vmatprep.subr.mxu1 %v177_v17  ;;  %v1059_v60 = vld [vmem:[#allocation7 + $0x178] sm:$0xff]  ;;  %v880_v63 = vld [vmem:[#allocation7 + $0x120] sm:$0xff]  ;;  %v1057_v2 = vld [vmem:[#allocation7 + $0x168] sm:$0xff] }
  0x4e   :  { %1499 = vmatpush3.msra.mxu0 %v270_v16  ;;  %1518 = vmatpush3.msra.mxu1 %v177_v17  ;;  %v1056_v3 = vld [vmem:[#allocation7 + $0x160] sm:$0xff]  ;;  %v877_v4 = vld [vmem:[#allocation7 + $0x108] sm:$0xff]  ;;  %v1055_v5 = vld [vmem:[#allocation7 + $0x158] sm:$0xff] }
  0x4f   :  { %1500 = vmatprep.subr.mxu0 %v269_v18  ;;  %1519 = vmatprep.subr.mxu1 %v176_v19  ;;  %v876_v6 = vld [vmem:[#allocation7 + $0x100] sm:$0xff]  ;;  %v1054_v7 = vld [vmem:[#allocation7 + $0x150] sm:$0xff]  ;;  %v1053_v8 = vld [vmem:[#allocation7 + $0x148] sm:$0xff] }
  0x50   :  { %1501 = vmatpush3.msra.mxu0 %v269_v18  ;;  %1520 = vmatpush3.msra.mxu1 %v176_v19  ;;  %v1052_v9 = vld [vmem:[#allocation7 + $0x140] sm:$0xff] }
  0x51   :  { %1502 = vmatprep.subr.mxu0 %v268_v20  ;;  %1521 = vmatprep.subr.mxu1 %v175_v21 }
  0x52   :  { %1503 = vmatpush3.msra.mxu0 %v268_v20  ;;  %1522 = vmatpush3.msra.mxu1 %v175_v21 }
  0x53   :  { %1526 = vmatprep.subr.mxu0 %v1852_v0  ;;  %1533 = vmatprep.subr.mxu1 %v531_v22 }
 0x102   :  { %v1480_v23 = vpop.f32.mrf.mxu0  ;;  %v1487_v24 = vpop.f32.mrf.mxu1 }
 0x104   :  { %v166_v25 = vpop.f32.mrf.mxu0  ;;  %v258_v26 = vpop.f32.mrf.mxu1 }
 0x105   :  { %1504 = vmatprep.mubr.msk.f32.mxu0 %vm276_vm1, %v258_v26  ;;  %1523 = vmatprep.mubr.msk.f32.mxu1 %vm276_vm1, %v166_v25 }
 0x106   :  { %1505 = vmatmul.mubr.msk.f32.vlgmr.msra.gmra.mxu0 %vm276_vm1, %v1487_v24  ;;  %1524 = vmatmul.mubr.msk.f32.vlgmr.msra.gmra.mxu1 %vm276_vm1, %v1480_v23  ;;  %v1143_v24 = vld [vmem:[#allocation8] sm:$0xff] }
 0x107   :  { %1527 = vmatpush3.msra.mxu0 %v1852_v0  ;;  %1530 = vmatprep.mubr.msk.f32.mxu0 %vm93_vm0, %v440_v27 }
 0x108   :  { %1528 = vmatprep.subr.mxu0 %v1854_v1  ;;  %1534 = vmatpush3.msra.mxu1 %v531_v22 }
 0x109   :  { %1529 = vmatpush3.msra.mxu0 %v1854_v1  ;;  %1535 = vmatprep.subr.mxu1 %v530_v28 }
 0x10a   :  { %1531 = vmatmul.mubr.msk.f32.vlgmr.msra.gmra.mxu0 %vm93_vm0, %v441_v29  ;;  %1552 = vmatprep.subr.mxu0 %v1852_v0 }
 0x10b   :  { %1553 = vmatpush3.msra.mxu0 %v1852_v0  ;;  %1556 = vmatprep.mubr.msk.f32.mxu0 %vm93_vm0, %v616_v30 }
 0x10c   :  { %1554 = vmatprep.subr.mxu0 %v1854_v1  ;;  %1536 = vmatpush3.msra.mxu1 %v530_v28 }
 0x10d   :  { %1555 = vmatpush3.msra.mxu0 %v1854_v1  ;;  %1537 = vmatprep.subr.mxu1 %v529_v31 }
 0x10e   :  { %1557 = vmatmul.mubr.msk.f32.vlgmr.msra.gmra.mxu0 %vm93_vm0, %v617_v32  ;;  %1559 = vmatprep.subr.mxu0 %v707_v33 }
 0x10f   :  { %1538 = vmatpush3.msra.mxu1 %v529_v31  ;;  %1560 = vmatpush3.msra.mxu0 %v707_v33  ;;  %v1144_v33 = vld [vmem:[#allocation8 + $0x8] sm:$0xff] }
 0x110   :  { %1539 = vmatprep.subr.mxu1 %v528_v34  ;;  %1561 = vmatprep.subr.mxu0 %v706_v35 }
 0x111   :  { %1540 = vmatpush3.msra.mxu1 %v528_v34  ;;  %1562 = vmatpush3.msra.mxu0 %v706_v35  ;;  %v1227_v34 = vld [vmem:[#allocation8 + $0x10] sm:$0xff] }
 0x112   :  { %1541 = vmatprep.subr.mxu1 %v527_v36  ;;  %1563 = vmatprep.subr.mxu0 %v705_v37 }
 0x113   :  { %1542 = vmatpush3.msra.mxu1 %v527_v36  ;;  %1564 = vmatpush3.msra.mxu0 %v705_v37  ;;  %v1228_v37 = vld [vmem:[#allocation8 + $0x18] sm:$0xff] }
 0x114   :  { %1543 = vmatprep.subr.mxu1 %v526_v38  ;;  %1565 = vmatprep.subr.mxu0 %v704_v39 }
 0x115   :  { %1544 = vmatpush3.msra.mxu1 %v526_v38  ;;  %1566 = vmatpush3.msra.mxu0 %v704_v39 }
 0x116   :  { %1545 = vmatprep.subr.mxu1 %v525_v40  ;;  %1567 = vmatprep.subr.mxu0 %v703_v41 }
 0x117   :  { %1546 = vmatpush3.msra.mxu1 %v525_v40  ;;  %1568 = vmatpush3.msra.mxu0 %v703_v41 }
 0x118   :  { %1547 = vmatprep.subr.mxu1 %v524_v42  ;;  %1569 = vmatprep.subr.mxu0 %v702_v43 }
 0x119   :  { %1548 = vmatpush3.msra.mxu1 %v524_v42  ;;  %1570 = vmatpush3.msra.mxu0 %v702_v43  ;;  %v1329_v42 = vld [vmem:[#allocation10] sm:$0xff] }
 0x11a   :  { %1571 = vmatprep.subr.mxu0 %v701_v44  ;;  %1578 = vmatprep.subr.mxu1 %v1852_v0 }
 0x11b   :  { %1572 = vmatpush3.msra.mxu0 %v701_v44 }
 0x11c   :  { %1573 = vmatprep.subr.mxu0 %v700_v45 }
 0x11d   :  { %1574 = vmatpush3.msra.mxu0 %v700_v45 }
 0x11e   :  { %1604 = vmatprep.subr.mxu0 %v1852_v0 }
 0x1c6   :  { %v1506_v46 = vpop.f32.mrf.mxu0  ;;  %v1525_v47 = vpop.f32.mrf.mxu1 }
 0x1c7   :  { %v1886_v48 = vadd.f32 %v1525_v47, %v1506_v46  ;;  %v1330_v46 = vld [vmem:[#allocation10 + $0x8] sm:$0xff] }
 0x1c8   :  { %v1888_v49 = vpop.f32.mrf.mxu0  ;;  %v430_v10 = vpop.f32.mrf.mxu1 }
 0x1c9   :  { %v431_v12 = vadd.f32 %v430_v10, %v1888_v49 }
 0x1ca   :  { %v1532_v50 = vpop.f32.mrf.mxu0 }
 0x1cc   :  { %v514_v51 = vpop.f32.mrf.mxu0 }
 0x1cd   :  { %1549 = vmatprep.mubr.msk.f32.mxu1 %vm276_vm1, %v514_v51 }
 0x1ce   :  { %1550 = vmatmul.mubr.msk.f32.vlgmr.msra.gmra.mxu1 %vm276_vm1, %v1532_v50  ;;  %v1558_v53 = vpop.f32.mrf.mxu0 }
 0x1cf   :  { %1579 = vmatpush3.msra.mxu1 %v1852_v0  ;;  %1582 = vmatprep.mubr.msk.f32.mxu1 %vm93_vm0, %v792_v52 }
 0x1d0   :  { %v690_v55 = vpop.f32.mrf.mxu0  ;;  %1580 = vmatprep.subr.mxu1 %v1854_v1 }
 0x1d1   :  { %1575 = vmatprep.mubr.msk.f32.mxu0 %vm276_vm1, %v690_v55  ;;  %1581 = vmatpush3.msra.mxu1 %v1854_v1 }
 0x1d2   :  { %1576 = vmatmul.mubr.msk.f32.vlgmr.msra.gmra.mxu0 %vm276_vm1, %v1558_v53  ;;  %1583 = vmatmul.mubr.msk.f32.vlgmr.msra.gmra.mxu1 %vm93_vm0, %v793_v54 }
 0x1d3   :  { %1605 = vmatpush3.msra.mxu0 %v1852_v0  ;;  %1608 = vmatprep.mubr.msk.f32.mxu0 %vm93_vm0, %v968_v56  ;;  %v879_v0 = vld [vmem:[#allocation7 + $0x118] sm:$0xff] }
 0x1d4   :  { %1606 = vmatprep.subr.mxu0 %v1854_v1  ;;  %1585 = vmatprep.subr.mxu1 %v883_v57 }
 0x1d5   :  { %1607 = vmatpush3.msra.mxu0 %v1854_v1  ;;  %1586 = vmatpush3.msra.mxu1 %v883_v57  ;;  %v878_v1 = vld [vmem:[#allocation7 + $0x110] sm:$0xff] }
 0x1d6   :  { %1609 = vmatmul.mubr.msk.f32.vlgmr.msra.gmra.mxu0 %vm93_vm0, %v969_v58  ;;  %1587 = vmatprep.subr.mxu1 %v882_v59 }
 0x1d7   :  { %1588 = vmatpush3.msra.mxu1 %v882_v59  ;;  %1611 = vmatprep.subr.mxu0 %v1059_v60 }
 0x1d8   :  { %1589 = vmatprep.subr.mxu1 %v881_v61  ;;  %1612 = vmatpush3.msra.mxu0 %v1059_v60 }
 0x1d9   :  { %1590 = vmatpush3.msra.mxu1 %v881_v61  ;;  %1613 = vmatprep.subr.mxu0 %v1058_v62 }
 0x1da   :  { %1591 = vmatprep.subr.mxu1 %v880_v63  ;;  %1614 = vmatpush3.msra.mxu0 %v1058_v62 }
 0x1db   :  { %1592 = vmatpush3.msra.mxu1 %v880_v63  ;;  %1615 = vmatprep.subr.mxu0 %v1057_v2 }
 0x1dc   :  { %1593 = vmatprep.subr.mxu1 %v879_v0  ;;  %1616 = vmatpush3.msra.mxu0 %v1057_v2 }
 0x1dd   :  { %1594 = vmatpush3.msra.mxu1 %v879_v0  ;;  %1617 = vmatprep.subr.mxu0 %v1056_v3 }
 0x1de   :  { %1595 = vmatprep.subr.mxu1 %v878_v1  ;;  %1618 = vmatpush3.msra.mxu0 %v1056_v3 }
 0x1df   :  { %1596 = vmatpush3.msra.mxu1 %v878_v1  ;;  %1619 = vmatprep.subr.mxu0 %v1055_v5 }
 0x1e0   :  { %1597 = vmatprep.subr.mxu1 %v877_v4  ;;  %1620 = vmatpush3.msra.mxu0 %v1055_v5 }
 0x1e1   :  { %1598 = vmatpush3.msra.mxu1 %v877_v4  ;;  %1621 = vmatprep.subr.mxu0 %v1054_v7 }
 0x1e2   :  { %1599 = vmatprep.subr.mxu1 %v876_v6  ;;  %1622 = vmatpush3.msra.mxu0 %v1054_v7 }
 0x1e3   :  { %1600 = vmatpush3.msra.mxu1 %v876_v6  ;;  %1623 = vmatprep.subr.mxu0 %v1053_v8 }
 0x1e4   :  { %1624 = vmatpush3.msra.mxu0 %v1053_v8 }
 0x1e5   :  { %1625 = vmatprep.subr.mxu0 %v1052_v9 }
 0x1e6   :  { %1626 = vmatpush3.msra.mxu0 %v1052_v9 }
 0x28e   :  { %v1551_v11 = vpop.f32.mrf.mxu1 }
 0x28f   :  { %v614_v13 = vadd.f32 %v1551_v11, %v1886_v48 }
 0x290   :  { %v604_v14 = vpop.f32.mrf.mxu1 }
 0x291   :  { %v613_v15 = vadd.f32 %v604_v14, %v431_v12 }
 0x292   :  { %v1577_v16 = vpop.f32.mrf.mxu0  ;;  %v1584_v17 = vpop.f32.mrf.mxu1 }
 0x293   :  { %v790_v18 = vadd.f32 %v1577_v16, %v614_v13 }
 0x294   :  { %v780_v19 = vpop.f32.mrf.mxu0  ;;  %v866_v20 = vpop.f32.mrf.mxu1 }
 0x295   :  { %v789_v21 = vadd.f32 %v780_v19, %v613_v15  ;;  %1601 = vmatprep.mubr.msk.f32.mxu1 %vm276_vm1, %v866_v20 }
 0x296   :  { %1602 = vmatmul.mubr.msk.f32.vlgmr.msra.gmra.mxu1 %vm276_vm1, %v1584_v17  ;;  %v1610_v22 = vpop.f32.mrf.mxu0 }
 0x297   :  { %1634 = vmatprep.mubr.msk.f32.mxu1 %vm93_vm0, %v1143_v24 }
 0x298   :  { %v1042_v23 = vpop.f32.mrf.mxu0 }
 0x299   :  { %1627 = vmatprep.mubr.msk.f32.mxu0 %vm276_vm1, %v1042_v23 }
 0x29a   :  { %1628 = vmatmul.mubr.msk.f32.vlgmr.msra.gmra.mxu0 %vm276_vm1, %v1610_v22 }
 0x356   :  { %v1603_v25 = vpop.f32.mrf.mxu1 }
 0x357   :  { %v966_v27 = vadd.f32 %v1603_v25, %v790_v18 }
 0x358   :  { %v956_v26 = vpop.f32.mrf.mxu1 }
 0x359   :  { %v965_v29 = vadd.f32 %v956_v26, %v789_v21 }
 0x35a   :  { %v1629_v28 = vpop.f32.mrf.mxu0 }
 0x35b   :  { %v1142_v30 = vadd.f32 %v1629_v28, %v966_v27 }
 0x35c   :  { %v1132_v31 = vpop.f32.mrf.mxu0 }
 0x35d   :  { %v1141_v32 = vadd.f32 %v1132_v31, %v965_v29  ;;  %1233 = vrot.lane.b32.xlu0 %v1142_v30, %s1789_s2  ;;  %1630 = vmatprep.subr.mxu1 %v1142_v30 }
 0x35e   :  { %1631 = vmatpush3.msra.mxu1 %v1142_v30 }
 0x35f   :  { %1632 = vmatprep.subr.mxu1 %v1141_v32 }
 0x360   :  { %1633 = vmatpush3.msra.mxu1 %v1141_v32 }
 0x361   :  { %1231 = vrot.lane.b32.xlu0 %v1141_v32, %s1789_s2  ;;  %1635 = vmatmul.mubr.msk.f32.vlgmr.msra.gmra.mxu1 %vm93_vm0, %v1144_v33 }
 0x362   :  { %1641 = vmatprep.mubr.msk.f32.mxu1 %vm93_vm0, %v1227_v34 }
 0x3cf   :  { %v1234_v35 = vpop.permute.xlu0 %1233 }
 0x3d0   :  { %1637 = vmatprep.subr.mxu1 %v1234_v35 }
 0x3d1   :  { %1638 = vmatpush3.msra.mxu1 %v1234_v35 }
 0x3d3   :  { %v1232_v36 = vpop.permute.xlu0 %1231 }
 0x3d4   :  { %1639 = vmatprep.subr.mxu1 %v1232_v36 }
 0x3d5   :  { %1640 = vmatpush3.msra.mxu1 %v1232_v36 }
 0x3d6   :  { %1642 = vmatmul.mubr.msk.f32.vlgmr.msra.gmra.mxu1 %vm93_vm0, %v1228_v37 }
 0x421   :  { %v1636_v38 = vpop.f32.mrf.mxu1 }
 0x423   :  { %v1217_v39 = vpop.f32.mrf.mxu1 }
 0x496   :  { %v1643_v40 = vpop.f32.mrf.mxu1 }
 0x498   :  { %v1309_v41 = vpop.f32.mrf.mxu1 }
 0x499   :  { %1320 = vrot.lane.b32.xlu1 %v1309_v41, %s1790_s4 }
 0x49d   :  { %1322 = vrot.lane.b32.xlu1 %v1643_v40, %s1790_s4 }
 0x50b   :  { %v1321_v43 = vpop.permute.xlu1 %1320 }
 0x50c   :  { %v1327_v44 = vsel %vm1326_vm2, %v1217_v39, %v1321_v43 }
 0x50d   :  { %v1331_v45 = vadd.f32 %v1329_v42, %v1327_v44 }
 0x50f   :  { %1333 = vst.msk [vmem:[#allocation11] sm:$0xff] %vm276_vm1, %v1331_v45  ;;  %v1323_v47 = vpop.permute.xlu1 %1322 }
 0x510   :  { %v1328_v48 = vsel %vm1326_vm2, %v1636_v38, %v1323_v47 }
 0x511   :  { %v1332_v49 = vadd.f32 %v1330_v46, %v1328_v48 }
 0x513   :  { %1334 = vst.msk [vmem:[#allocation11 + $0x8] sm:$0xff] %vm276_vm1, %v1332_v49 }
 0x514   :  { %1765 = shalt.err (!%p1762_p1)
}
 0x515   :  { %1346 = dma.vmem_to_hbm [thread:$0]  %s1341_s18, 256, %s1927_s5, [#allocation4], %s1784_s23, %s1784_s23, %s1785_s24  }
 0x516   :  { %1780 = dma.done.wait [#allocation4], 256  }
 0x517   :  { %1781 = vsyncadd [#allocation4], 4294967040 }
 0x518   :  { %1350 = vsyncpa [#allocation3], 1 }
 0x519   :  { %1351 = vsyncpa [#allocation6], 1 }
 0x51a   :  { %1352 = vsyncpa [#allocation9], 1 }
 0x51b   :  { %1353 = vsyncpa [#allocation4], 1 }

</bundles_post_ra>
